<compile_context>
chip_gen: v7x
topology: tpu7x:2x2x1
jax: 0.10.0
libtpu: 0.0.40
codegen_flags: <defaults>
</compile_context>

<pallas_src>
import functools

import jax
import jax.numpy as jnp
from jax.experimental import pallas as pl
from jax.experimental.pallas import tpu as pltpu


def _round_up(x, m):
    return ((x + m - 1) // m) * m


# ----------------------------------------------------------------------------
# Pallas kernel: one batch tile through backbone -> fused experts -> attention
# -> tower.  All weights stay VMEM-resident across the batch grid.
# ----------------------------------------------------------------------------
def _moe_q_kernel(compute_dtype, exact_softmax,
                  xin_ref,
                  w1_ref, w2_ref, ew1_ref, wkv_ref, tqsel_ref, sel_ref, selt_ref,
                  tw1_ref, tw2_ref, tw3_ref,
                  bh1_ref, bh2_ref, eb1_ref, bkv_ref, tb3_ref,
                  out_ref):
    f32 = jnp.float32
    cd = compute_dtype
    x = xin_ref[...]                                   # (bt, D_in), compute dtype

    # Backbone: Linear -> ReLU -> Linear.  obs/act halves pre-fused into one
    # weight; the appended one-hot columns hit all-zero rows (exact no-op).
    h = jnp.dot(x, w1_ref[...], preferred_element_type=f32) + bh1_ref[0:1, :]
    h = jnp.maximum(h, 0.0)
    bo = jnp.dot(h.astype(cd), w2_ref[...], preferred_element_type=f32) + bh2_ref[0:1, :]

    # All experts' first layers fused into one wide lane-dense matmul.
    eh = jnp.dot(bo.astype(cd), ew1_ref[...], preferred_element_type=f32) + eb1_ref[...]
    eh = jnp.maximum(eh, 0.0).astype(cd)               # (bt, L*E1)

    # Expert layer-2 folded into the key|value projections, both fused into
    # ONE block-diagonal (L*E1, 2*L*E2) RHS (fills the 256-wide MXU); split at
    # the L*E2 (128-lane tile) boundary -> cheap vreg-aligned views.
    le2 = sel_ref.shape[0]                             # L * E2 (static)
    kv = jnp.dot(eh, wkv_ref[...], preferred_element_type=f32) + bkv_ref[...]
    k_wide = kv[:, :le2]
    v_wide = kv[:, le2:]

    # Per-expert-replicated task query rebuilt in VMEM from the packed one-hot
    # columns (no replicated (B, L*E2) HBM input).
    qt_wide = jnp.dot(x, tqsel_ref[...], preferred_element_type=f32)

    # Attention scores: per-expert block reduction via a 0/1 selector matmul
    # (no 3-D reshape, no per-expert lane slices).
    prod = (k_wide * qt_wide).astype(cd)
    scores = jnp.dot(prod, sel_ref[...], preferred_element_type=f32)   # (bt, L)
    scores = scores - jnp.max(scores, axis=-1, keepdims=True)
    ex = jnp.exp(scores)
    denom = jnp.sum(ex, axis=-1, keepdims=True)
    if exact_softmax:
        w = ex / denom
    else:
        w = ex * pl.reciprocal(denom, approx=True)     # EUP slot (~free)
    # NOTE: reg = -(mu/L)*sum(w + 1e-6) is analytically constant (softmax sums
    # to 1); it is produced in the wrapper, not here.

    # Broadcast attention weights back to the wide layout; the sum over experts
    # is folded into the row-tiled first tower weight, so `tower_input` is
    # never materialized.
    w_wide = jnp.dot(w.astype(cd), selt_ref[...], preferred_element_type=f32)
    mixed = (w_wide * v_wide).astype(cd)

    # Tower: Linear -> ReLU -> Linear -> ReLU -> Linear (width-1 f32 output,
    # contiguous HBM writeback).
    t1 = jnp.maximum(
        jnp.dot(mixed, tw1_ref[...], preferred_element_type=f32) + bh1_ref[1:2, :], 0.0)
    t2 = jnp.maximum(
        jnp.dot(t1.astype(cd), tw2_ref[...], preferred_element_type=f32) + bh2_ref[1:2, :], 0.0)
    out_ref[...] = (jnp.dot(t2.astype(cd), tw3_ref[...], preferred_element_type=f32)
                    + tb3_ref[...])


# ----------------------------------------------------------------------------
# One-time weight preprocessing (hoisted off the per-step path).
# ----------------------------------------------------------------------------
def prepare_moe_q_weights(params, *, num_tasks, num_experts,
                          compute_dtype=jnp.bfloat16):
    f32 = jnp.float32
    hp = jax.lax.Precision.HIGHEST
    cd = compute_dtype
    L = num_experts

    in_dim, H1 = params["bW1"].shape            # in_dim = obs_nt + act_dim
    H2 = params["bW2"].shape[1]
    E1 = params["eW1"].shape[2]
    E2 = params["eW2"].shape[2]
    D_in = in_dim + num_tasks

    # Backbone L1: obs/act fused; zero rows for the appended one-hot columns.
    w1 = jnp.concatenate([params["bW1"], jnp.zeros((num_tasks, H1), f32)], axis=0)

    # All experts' first layers as one wide (H2, L*E1) matmul, expert-major.
    ew1 = params["eW1"].transpose(1, 0, 2).reshape(H2, L * E1)
    eb1 = params["eb1"].transpose(1, 0, 2).reshape(1, L * E1)

    # Fold expert layer-2 into key/value projections, block-diagonal layout,
    # key & value concatenated into a single (L*E1, 2*L*E2) RHS.
    Wk = jnp.einsum('lef,lfg->leg', params["eW2"], params["key"], precision=hp)
    Wv = jnp.einsum('lef,lfg->leg', params["eW2"], params["val"], precision=hp)
    bk = jnp.einsum('lf,lfg->lg', params["eb2"][:, 0, :], params["key"], precision=hp)
    bv = jnp.einsum('lf,lfg->lg', params["eb2"][:, 0, :], params["val"], precision=hp)
    eyeL = jnp.eye(L, dtype=f32)

    def block_diag(W):                          # (L, E1, E2) -> (L*E1, L*E2)
        return (W[:, None] * eyeL[:, :, None, None]).transpose(0, 2, 1, 3) \
                                                    .reshape(L * E1, L * E2)

    wkv = jnp.concatenate([block_diag(Wk), block_diag(Wv)], axis=1)
    bkv = jnp.concatenate([bk.reshape(1, L * E2), bv.reshape(1, L * E2)], axis=1)

    # One-hot -> per-expert-replicated task query; zero rows for obs/act cols.
    tqsel = jnp.concatenate([jnp.zeros((in_dim, L * E2), f32),
                             jnp.tile(params["tq"], (1, L))], axis=0)

    # 0/1 selector matrices: per-expert block-sum / per-expert broadcast.
    sel = jnp.repeat(eyeL, E2, axis=0)          # (L*E2, L)
    selt = jnp.repeat(eyeL, E2, axis=1)         # (L, L*E2)

    # Tower: first weight row-tiled L times (folds the expert-weighted sum).
    tw1 = jnp.tile(params["tW1"], (L, 1))       # (L*E2, H1)

    # Grouped f32 biases (sublane-sliced inside the kernel).
    bh1 = jnp.concatenate([params["bb1"], params["tb1"]], axis=0)   # (2, H1)
    bh2 = jnp.concatenate([params["bb2"], params["tb2"]], axis=0)   # (2, H2)

    weights = (w1.astype(cd), params["bW2"].astype(cd), ew1.astype(cd),
               wkv.astype(cd), tqsel.astype(cd), sel.astype(cd), selt.astype(cd),
               tw1.astype(cd), params["tW2"].astype(cd), params["tW3"].astype(cd),
               bh1, bh2, eb1, bkv, params["tb3"])

    dims = dict(num_tasks=num_tasks, L=L, D_in=D_in, H1=H1, H2=H2, E1=E1, E2=E2)
    return dict(weights=weights, dims=dims, compute_dtype=cd)


# ----------------------------------------------------------------------------
# Per-call wrapper: input packing + batch-gridded pallas_call.
# ----------------------------------------------------------------------------
def moe_q_forward(prep, obs, act, *, mu, block_b=512, exact_softmax=False):
    f32 = jnp.float32
    weights = prep["weights"]
    dims = prep["dims"]
    cd = prep["compute_dtype"]
    nt, L, D_in = dims["num_tasks"], dims["L"], dims["D_in"]
    H1, H2, E1, E2 = dims["H1"], dims["H2"], dims["E1"], dims["E2"]

    B = obs.shape[0]
    obs_nt = obs.shape[1] - nt
    assert obs_nt + act.shape[1] + nt == D_in

    # argmax -> strict one-hot in the wrapper preserves first-max tie-break.
    task = jnp.argmax(obs[:, obs_nt:], axis=-1)
    onehot = jax.nn.one_hot(task, nt, dtype=f32)
    xin = jnp.concatenate([obs[:, :obs_nt], act, onehot], axis=-1).astype(cd)

    # Batch tiling: bt multiple of 8, EVEN number of tiles (>=2) so the
    # "parallel" grid axis shards across both TensorCores on v7x.
    bt0 = min(_round_up(block_b, 8), _round_up(B, 8))
    n = -(-B // bt0)
    n = max(n, 2)
    if n % 2:
        n += 1
    bt = _round_up(-(-B // n), 8)
    Bp = n * bt
    if Bp != B:
        xin = jnp.pad(xin, ((0, Bp - B), (0, 0)))

    cd_bytes = jnp.dtype(cd).itemsize
    macs = (D_in * H1 + H1 * H2 + H2 * (L * E1) + (L * E1) * (2 * L * E2)
            + D_in * (L * E2) + 2 * (L * E2) * L
            + (L * E2) * H1 + H1 * H2 + H2)
    weight_bytes = sum(int(a.size) * a.dtype.itemsize for a in weights)
    cost = pl.CostEstimate(
        flops=int(2 * Bp * macs),
        transcendentals=int(Bp * (L + 1)),
        bytes_accessed=int(Bp * D_in * cd_bytes + weight_bytes + Bp * 4))

    # VMEM: resident weights (double-buffered worst case) + in/out tiles +
    # f32 intermediates, x2 headroom; small floor; fits v7x's 64 MiB VMEM.
    interm_cols = 2 * H1 + 2 * H2 + 2 * (L * E1) + 8 * (L * E2)
    need = (2 * weight_bytes + 2 * bt * D_in * cd_bytes
            + 2 * bt * 128 * 4 + bt * interm_cols * 4)
    vmem_limit = int(min(max(2 * need, 12 * 2**20), 48 * 2**20))

    out = pl.pallas_call(
        functools.partial(_moe_q_kernel, cd, exact_softmax),
        out_shape=jax.ShapeDtypeStruct((Bp, 1), f32),
        grid=(n,),
        in_specs=[pl.BlockSpec((bt, D_in), lambda i: (i, 0))]
                 + [pl.BlockSpec(a.shape, lambda i: (0, 0)) for a in weights],
        out_specs=pl.BlockSpec((bt, 1), lambda i: (i, 0)),
        compiler_params=pltpu.CompilerParams(
            dimension_semantics=("parallel",),
            vmem_limit_bytes=vmem_limit),
        cost_estimate=cost,
    )(xin, *weights)

    q = out[:B, 0]
    # reg = -(mu/L) * sum(softmax + 1e-6) is analytically constant.
    reg = jnp.full((B,), -(mu / L) * (1.0 + L * 1e-6), f32)
    return q, reg


# ----------------------------------------------------------------------------
# Deterministic synthetic parameter init (shapes follow MoEQFunction.__init__).
# Linear weights stored as (in_features, out_features).
# ----------------------------------------------------------------------------
def init_params(key, *, obs_dim, act_dim, num_tasks,
                backbone_hidden, expert_hidden, num_experts):
    obs_nt = obs_dim - num_tasks
    H1, H2 = backbone_hidden
    E1, E2 = expert_hidden            # E2 == task_queries_dim
    ks = list(jax.random.split(key, 16))

    def lin(k, fin, fout):
        k1, k2 = jax.random.split(k)
        s = 1.0 / jnp.sqrt(jnp.float32(fin))
        W = jax.random.uniform(k1, (fin, fout), jnp.float32, -s, s)
        b = jax.random.uniform(k2, (1, fout), jnp.float32, -s, s)
        return W, b

    p = {}
    p["bW1"], p["bb1"] = lin(ks[0], obs_nt + act_dim, H1)
    p["bW2"], p["bb2"] = lin(ks[1], H1, H2)

    eW1, eb1, eW2, eb2 = [], [], [], []
    ek = jax.random.split(ks[2], num_experts)
    for l in range(num_experts):
        k1, k2 = jax.random.split(ek[l])
        W1, b1 = lin(k1, H2, E1)
        W2, b2 = lin(k2, E1, E2)
        eW1.append(W1); eb1.append(b1[None])
        eW2.append(W2); eb2.append(b2[None])
    p["eW1"] = jnp.stack(eW1)                       # (L, H2, E1)
    p["eb1"] = jnp.concatenate(eb1, 0)              # (L, 1, E1)
    p["eW2"] = jnp.stack(eW2)                       # (L, E1, E2)
    p["eb2"] = jnp.concatenate(eb2, 0)              # (L, 1, E2)

    p["tq"] = jax.random.normal(ks[3], (num_tasks, E2), jnp.float32)
    p["key"] = jax.random.normal(ks[4], (num_experts, E2, E2), jnp.float32)
    p["val"] = jax.random.normal(ks[5], (num_experts, E2, E2), jnp.float32)

    p["tW1"], p["tb1"] = lin(ks[6], E2, H1)
    p["tW2"], p["tb2"] = lin(ks[7], H1, H2)
    p["tW3"], p["tb3"] = lin(ks[8], H2, 1)
    return p


# ----------------------------------------------------------------------------
# Pure-JAX reference (mirrors the PyTorch forward exactly, highest precision).
# ----------------------------------------------------------------------------
def reference(params, obs, act, *, num_tasks, num_experts, mu):
    hp = jax.lax.Precision.HIGHEST
    onehot = obs[:, -num_tasks:]
    task = jnp.argmax(onehot, axis=-1)
    o = obs[:, :-num_tasks]
    x = jnp.concatenate([o, act], -1)
    h = jax.nn.relu(jnp.dot(x, params["bW1"], precision=hp) + params["bb1"])
    bo = jnp.dot(h, params["bW2"], precision=hp) + params["bb2"]
    outs = []
    for l in range(num_experts):
        eh = jax.nn.relu(jnp.dot(bo, params["eW1"][l], precision=hp) + params["eb1"][l])
        outs.append(jnp.dot(eh, params["eW2"][l], precision=hp) + params["eb2"][l])
    eo = jnp.stack(outs, 1)
    keys = jnp.einsum('kli,lij->klj', eo, params["key"], precision=hp)
    vals = jnp.einsum('kli,lij->klj', eo, params["val"], precision=hp)
    qtask = params["tq"][task]
    scores = jnp.einsum('kni,ki->kn', keys, qtask, precision=hp)
    w = jax.nn.softmax(scores, -1)
    ti = jnp.einsum('kn,kni->ki', w, vals, precision=hp)
    reg = -(1.0 / num_experts) * mu * jnp.sum(w + 1e-6, -1)
    t1 = jax.nn.relu(jnp.dot(ti, params["tW1"], precision=hp) + params["tb1"])
    t2 = jax.nn.relu(jnp.dot(t1, params["tW2"], precision=hp) + params["tb2"])
    q = jnp.dot(t2, params["tW3"], precision=hp) + params["tb3"]
    return jnp.squeeze(q, -1), reg


if __name__ == "__main__":
    num_tasks = 4
    obs_dim = 16            # includes the task one-hot (last num_tasks dims)
    act_dim = 8
    backbone_hidden = (32, 32)
    expert_hidden = (32, 32)
    num_experts = 4
    mu = 0.01

    root = jax.random.PRNGKey(0)
    kp, kx, ka, kt = jax.random.split(root, 4)
    params = init_params(kp, obs_dim=obs_dim, act_dim=act_dim,
                         num_tasks=num_tasks, backbone_hidden=backbone_hidden,
                         expert_hidden=expert_hidden, num_experts=num_experts)

    def make_batch(key, B):
        k1, k2, k3 = jax.random.split(key, 3)
        feats = jax.random.normal(k1, (B, obs_dim - num_tasks), jnp.float32)
        onehot = jax.nn.one_hot(jax.random.randint(k3, (B,), 0, num_tasks),
                                num_tasks, dtype=jnp.float32)
        o = jnp.concatenate([feats, onehot], axis=-1)
        a = jax.random.normal(k2, (B, act_dim), jnp.float32)
        return o, a

    # --- small batch, f32 matmuls + exact softmax: tight numerical check -----
    prep_f32 = prepare_moe_q_weights(params, num_tasks=num_tasks,
                                     num_experts=num_experts,
                                     compute_dtype=jnp.float32)
    B1 = 8
    obs1, act1 = make_batch(kx, B1)
    q1, reg1 = moe_q_forward(prep_f32, obs1, act1, mu=mu, exact_softmax=True)
    jax.block_until_ready((q1, reg1))
    q1_ref, reg1_ref = reference(params, obs1, act1, num_tasks=num_tasks,
                                 num_experts=num_experts, mu=mu)
    assert q1.shape == (B1,) and reg1.shape == (B1,)
    assert jnp.allclose(q1, q1_ref, atol=1e-3, rtol=1e-3)
    assert jnp.allclose(reg1, reg1_ref, atol=1e-6, rtol=1e-5)

    # --- larger ragged batch, bf16 matmul inputs (recommended perf config):
    #     exercises the even 2-tile grid (v7x dual-core) + tail padding. ------
    prep_bf16 = prepare_moe_q_weights(params, num_tasks=num_tasks,
                                      num_experts=num_experts,
                                      compute_dtype=jnp.bfloat16)
    B2 = 300
    obs2, act2 = make_batch(kt, B2)
    q2, reg2 = moe_q_forward(prep_bf16, obs2, act2, mu=mu, block_b=512)
    jax.block_until_ready((q2, reg2))
    q2_ref, reg2_ref = reference(params, obs2, act2, num_tasks=num_tasks,
                                 num_experts=num_experts, mu=mu)
    assert q2.shape == (B2,) and reg2.shape == (B2,)
    # loose tolerance: bf16 matmul inputs; exact-math check is the f32 one above
    assert jnp.allclose(q2, q2_ref, atol=1e-1, rtol=1e-1)
    assert jnp.allclose(reg2, reg2_ref, atol=1e-6, rtol=1e-5)

    print("KERNEL_OK")
</pallas_src>

<mosaic_0001>
module attributes {stable_mosaic.version = 11 : i64} {
  func.func @_moe_q_kernel(%arg0: i32, %arg1: memref<8x24xf32, #tpu.memory_space<vmem>>, %arg2: memref<24x32xf32, #tpu.memory_space<vmem>>, %arg3: memref<32x32xf32, #tpu.memory_space<vmem>>, %arg4: memref<32x128xf32, #tpu.memory_space<vmem>>, %arg5: memref<128x256xf32, #tpu.memory_space<vmem>>, %arg6: memref<24x128xf32, #tpu.memory_space<vmem>>, %arg7: memref<128x4xf32, #tpu.memory_space<vmem>>, %arg8: memref<4x128xf32, #tpu.memory_space<vmem>>, %arg9: memref<128x32xf32, #tpu.memory_space<vmem>>, %arg10: memref<32x32xf32, #tpu.memory_space<vmem>>, %arg11: memref<32x1xf32, #tpu.memory_space<vmem>>, %arg12: memref<2x32xf32, #tpu.memory_space<vmem>>, %arg13: memref<2x32xf32, #tpu.memory_space<vmem>>, %arg14: memref<1x128xf32, #tpu.memory_space<vmem>>, %arg15: memref<1x256xf32, #tpu.memory_space<vmem>>, %arg16: memref<1x1xf32, #tpu.memory_space<vmem>>, %arg17: memref<8x1xf32, #tpu.memory_space<vmem>>) attributes {dimension_semantics = [#tpu.dimension_semantics<parallel>], iteration_bounds = array<i64: 2>, scalar_prefetch = 0 : i64, scratch_operands = 0 : i64, tpu.core_type = #tpu.core_type<tc>, window_params = [{transform_indices = @transform_0, window_bounds = array<i64: 8, 24>}, {pipeline_mode = #tpu.pipeline_mode<synchronous>, transform_indices = @transform_1, window_bounds = array<i64: 24, 32>}, {pipeline_mode = #tpu.pipeline_mode<synchronous>, transform_indices = @transform_2, window_bounds = array<i64: 32, 32>}, {pipeline_mode = #tpu.pipeline_mode<synchronous>, transform_indices = @transform_3, window_bounds = array<i64: 32, 128>}, {pipeline_mode = #tpu.pipeline_mode<synchronous>, transform_indices = @transform_4, window_bounds = array<i64: 128, 256>}, {pipeline_mode = #tpu.pipeline_mode<synchronous>, transform_indices = @transform_5, window_bounds = array<i64: 24, 128>}, {pipeline_mode = #tpu.pipeline_mode<synchronous>, transform_indices = @transform_6, window_bounds = array<i64: 128, 4>}, {pipeline_mode = #tpu.pipeline_mode<synchronous>, transform_indices = @transform_7, window_bounds = array<i64: 4, 128>}, {pipeline_mode = #tpu.pipeline_mode<synchronous>, transform_indices = @transform_8, window_bounds = array<i64: 128, 32>}, {pipeline_mode = #tpu.pipeline_mode<synchronous>, transform_indices = @transform_9, window_bounds = array<i64: 32, 32>}, {pipeline_mode = #tpu.pipeline_mode<synchronous>, transform_indices = @transform_10, window_bounds = array<i64: 32, 1>}, {pipeline_mode = #tpu.pipeline_mode<synchronous>, transform_indices = @transform_11, window_bounds = array<i64: 2, 32>}, {pipeline_mode = #tpu.pipeline_mode<synchronous>, transform_indices = @transform_12, window_bounds = array<i64: 2, 32>}, {pipeline_mode = #tpu.pipeline_mode<synchronous>, transform_indices = @transform_13, window_bounds = array<i64: 1, 128>}, {pipeline_mode = #tpu.pipeline_mode<synchronous>, transform_indices = @transform_14, window_bounds = array<i64: 1, 256>}, {pipeline_mode = #tpu.pipeline_mode<synchronous>, transform_indices = @transform_15, window_bounds = array<i64: 1, 1>}, {transform_indices = @transform_16, window_bounds = array<i64: 8, 1>}]} {
    %c0 = arith.constant 0 : index
    %c0_0 = arith.constant 0 : index
    %0 = vector.load %arg1[%c0, %c0_0] : memref<8x24xf32, #tpu.memory_space<vmem>>, vector<8x24xf32>
    %c0_1 = arith.constant 0 : index
    %c0_2 = arith.constant 0 : index
    %1 = vector.load %arg2[%c0_1, %c0_2] : memref<24x32xf32, #tpu.memory_space<vmem>>, vector<24x32xf32>
    %cst = arith.constant dense<0.000000e+00> : vector<8x32xf32>
    %2 = tpu.matmul %0, %1, %cst {dimension_numbers = #tpu.dot_dimension_numbers<[1], [0], [0], [1], [0, 0, 1, 1], [], []>} : vector<8x24xf32>, vector<24x32xf32>, vector<8x32xf32> -> vector<8x32xf32>
    %c0_3 = arith.constant 0 : index
    %c0_4 = arith.constant 0 : index
    %3 = vector.load %arg12[%c0_3, %c0_4] : memref<2x32xf32, #tpu.memory_space<vmem>>, vector<1x32xf32>
    %4 = vector.broadcast %3 : vector<1x32xf32> to vector<8x32xf32>
    %5 = arith.addf %2, %4 : vector<8x32xf32>
    %cst_5 = arith.constant 0.000000e+00 : f32
    %6 = vector.broadcast %cst_5 : f32 to vector<8x32xf32>
    %7 = arith.maximumf %5, %6 : vector<8x32xf32>
    %c0_6 = arith.constant 0 : index
    %c0_7 = arith.constant 0 : index
    %8 = vector.load %arg3[%c0_6, %c0_7] : memref<32x32xf32, #tpu.memory_space<vmem>>, vector<32x32xf32>
    %cst_8 = arith.constant dense<0.000000e+00> : vector<8x32xf32>
    %9 = tpu.matmul %7, %8, %cst_8 {dimension_numbers = #tpu.dot_dimension_numbers<[1], [0], [0], [1], [0, 0, 1, 1], [], []>} : vector<8x32xf32>, vector<32x32xf32>, vector<8x32xf32> -> vector<8x32xf32>
    %c0_9 = arith.constant 0 : index
    %c0_10 = arith.constant 0 : index
    %10 = vector.load %arg13[%c0_9, %c0_10] : memref<2x32xf32, #tpu.memory_space<vmem>>, vector<1x32xf32>
    %11 = vector.broadcast %10 : vector<1x32xf32> to vector<8x32xf32>
    %12 = arith.addf %9, %11 : vector<8x32xf32>
    %c0_11 = arith.constant 0 : index
    %c0_12 = arith.constant 0 : index
    %13 = vector.load %arg4[%c0_11, %c0_12] : memref<32x128xf32, #tpu.memory_space<vmem>>, vector<32x128xf32>
    %cst_13 = arith.constant dense<0.000000e+00> : vector<8x128xf32>
    %14 = tpu.matmul %12, %13, %cst_13 {dimension_numbers = #tpu.dot_dimension_numbers<[1], [0], [0], [1], [0, 0, 1, 1], [], []>} : vector<8x32xf32>, vector<32x128xf32>, vector<8x128xf32> -> vector<8x128xf32>
    %c0_14 = arith.constant 0 : index
    %c0_15 = arith.constant 0 : index
    %15 = vector.load %arg14[%c0_14, %c0_15] : memref<1x128xf32, #tpu.memory_space<vmem>>, vector<1x128xf32>
    %16 = vector.broadcast %15 : vector<1x128xf32> to vector<8x128xf32>
    %17 = arith.addf %14, %16 : vector<8x128xf32>
    %cst_16 = arith.constant 0.000000e+00 : f32
    %18 = vector.broadcast %cst_16 : f32 to vector<8x128xf32>
    %19 = arith.maximumf %17, %18 : vector<8x128xf32>
    %c0_17 = arith.constant 0 : index
    %c0_18 = arith.constant 0 : index
    %20 = vector.load %arg5[%c0_17, %c0_18] : memref<128x256xf32, #tpu.memory_space<vmem>>, vector<128x256xf32>
    %cst_19 = arith.constant dense<0.000000e+00> : vector<8x256xf32>
    %21 = tpu.matmul %19, %20, %cst_19 {dimension_numbers = #tpu.dot_dimension_numbers<[1], [0], [0], [1], [0, 0, 1, 1], [], []>} : vector<8x128xf32>, vector<128x256xf32>, vector<8x256xf32> -> vector<8x256xf32>
    %c0_20 = arith.constant 0 : index
    %c0_21 = arith.constant 0 : index
    %22 = vector.load %arg15[%c0_20, %c0_21] : memref<1x256xf32, #tpu.memory_space<vmem>>, vector<1x256xf32>
    %23 = vector.broadcast %22 : vector<1x256xf32> to vector<8x256xf32>
    %24 = arith.addf %21, %23 : vector<8x256xf32>
    %25 = vector.extract_strided_slice %24 {offsets = [0, 0], sizes = [8, 128], strides = [1, 1]} : vector<8x256xf32> to vector<8x128xf32>
    %26 = vector.extract_strided_slice %24 {offsets = [0, 128], sizes = [8, 128], strides = [1, 1]} : vector<8x256xf32> to vector<8x128xf32>
    %c0_22 = arith.constant 0 : index
    %c0_23 = arith.constant 0 : index
    %27 = vector.load %arg6[%c0_22, %c0_23] : memref<24x128xf32, #tpu.memory_space<vmem>>, vector<24x128xf32>
    %cst_24 = arith.constant dense<0.000000e+00> : vector<8x128xf32>
    %28 = tpu.matmul %0, %27, %cst_24 {dimension_numbers = #tpu.dot_dimension_numbers<[1], [0], [0], [1], [0, 0, 1, 1], [], []>} : vector<8x24xf32>, vector<24x128xf32>, vector<8x128xf32> -> vector<8x128xf32>
    %29 = arith.mulf %25, %28 : vector<8x128xf32>
    %c0_25 = arith.constant 0 : index
    %c0_26 = arith.constant 0 : index
    %30 = vector.load %arg7[%c0_25, %c0_26] : memref<128x4xf32, #tpu.memory_space<vmem>>, vector<128x4xf32>
    %cst_27 = arith.constant dense<0.000000e+00> : vector<8x4xf32>
    %31 = tpu.matmul %29, %30, %cst_27 {dimension_numbers = #tpu.dot_dimension_numbers<[1], [0], [0], [1], [0, 0, 1, 1], [], []>} : vector<8x128xf32>, vector<128x4xf32>, vector<8x4xf32> -> vector<8x4xf32>
    %cst_28 = arith.constant dense<0xFF800000> : vector<8xf32>
    %32 = vector.multi_reduction <maximumf>, %31, %cst_28 [1] : vector<8x4xf32> to vector<8xf32>
    %33 = vector.shape_cast %32 : vector<8xf32> to vector<8x1xf32>
    %34 = vector.broadcast %33 : vector<8x1xf32> to vector<8x4xf32>
    %35 = arith.subf %31, %34 : vector<8x4xf32>
    %36 = math.exp %35 : vector<8x4xf32>
    %cst_29 = arith.constant dense<0.000000e+00> : vector<8xf32>
    %37 = vector.multi_reduction <add>, %36, %cst_29 [1] : vector<8x4xf32> to vector<8xf32>
    %38 = vector.shape_cast %37 : vector<8xf32> to vector<8x1xf32>
    %39 = vector.broadcast %38 : vector<8x1xf32> to vector<8x4xf32>
    %40 = arith.divf %36, %39 : vector<8x4xf32>
    %c0_30 = arith.constant 0 : index
    %c0_31 = arith.constant 0 : index
    %41 = vector.load %arg8[%c0_30, %c0_31] : memref<4x128xf32, #tpu.memory_space<vmem>>, vector<4x128xf32>
    %cst_32 = arith.constant dense<0.000000e+00> : vector<8x128xf32>
    %42 = tpu.matmul %40, %41, %cst_32 {dimension_numbers = #tpu.dot_dimension_numbers<[1], [0], [0], [1], [0, 0, 1, 1], [], []>} : vector<8x4xf32>, vector<4x128xf32>, vector<8x128xf32> -> vector<8x128xf32>
    %43 = arith.mulf %42, %26 : vector<8x128xf32>
    %c0_33 = arith.constant 0 : index
    %c0_34 = arith.constant 0 : index
    %44 = vector.load %arg9[%c0_33, %c0_34] : memref<128x32xf32, #tpu.memory_space<vmem>>, vector<128x32xf32>
    %cst_35 = arith.constant dense<0.000000e+00> : vector<8x32xf32>
    %45 = tpu.matmul %43, %44, %cst_35 {dimension_numbers = #tpu.dot_dimension_numbers<[1], [0], [0], [1], [0, 0, 1, 1], [], []>} : vector<8x128xf32>, vector<128x32xf32>, vector<8x32xf32> -> vector<8x32xf32>
    %c1 = arith.constant 1 : index
    %c0_36 = arith.constant 0 : index
    %46 = vector.load %arg12[%c1, %c0_36] : memref<2x32xf32, #tpu.memory_space<vmem>>, vector<1x32xf32>
    %47 = vector.broadcast %46 : vector<1x32xf32> to vector<8x32xf32>
    %48 = arith.addf %45, %47 : vector<8x32xf32>
    %cst_37 = arith.constant 0.000000e+00 : f32
    %49 = vector.broadcast %cst_37 : f32 to vector<8x32xf32>
    %50 = arith.maximumf %48, %49 : vector<8x32xf32>
    %c0_38 = arith.constant 0 : index
    %c0_39 = arith.constant 0 : index
    %51 = vector.load %arg10[%c0_38, %c0_39] : memref<32x32xf32, #tpu.memory_space<vmem>>, vector<32x32xf32>
    %cst_40 = arith.constant dense<0.000000e+00> : vector<8x32xf32>
    %52 = tpu.matmul %50, %51, %cst_40 {dimension_numbers = #tpu.dot_dimension_numbers<[1], [0], [0], [1], [0, 0, 1, 1], [], []>} : vector<8x32xf32>, vector<32x32xf32>, vector<8x32xf32> -> vector<8x32xf32>
    %c1_41 = arith.constant 1 : index
    %c0_42 = arith.constant 0 : index
    %53 = vector.load %arg13[%c1_41, %c0_42] : memref<2x32xf32, #tpu.memory_space<vmem>>, vector<1x32xf32>
    %54 = vector.broadcast %53 : vector<1x32xf32> to vector<8x32xf32>
    %55 = arith.addf %52, %54 : vector<8x32xf32>
    %cst_43 = arith.constant 0.000000e+00 : f32
    %56 = vector.broadcast %cst_43 : f32 to vector<8x32xf32>
    %57 = arith.maximumf %55, %56 : vector<8x32xf32>
    %c0_44 = arith.constant 0 : index
    %c0_45 = arith.constant 0 : index
    %58 = vector.load %arg11[%c0_44, %c0_45] : memref<32x1xf32, #tpu.memory_space<vmem>>, vector<32x1xf32>
    %cst_46 = arith.constant dense<0.000000e+00> : vector<8x1xf32>
    %59 = tpu.matmul %57, %58, %cst_46 {dimension_numbers = #tpu.dot_dimension_numbers<[1], [0], [0], [1], [0, 0, 1, 1], [], []>} : vector<8x32xf32>, vector<32x1xf32>, vector<8x1xf32> -> vector<8x1xf32>
    %c0_47 = arith.constant 0 : index
    %c0_48 = arith.constant 0 : index
    %60 = vector.load %arg16[%c0_47, %c0_48] : memref<1x1xf32, #tpu.memory_space<vmem>>, vector<1x1xf32>
    %61 = vector.broadcast %60 : vector<1x1xf32> to vector<8x1xf32>
    %62 = arith.addf %59, %61 : vector<8x1xf32>
    %c0_49 = arith.constant 0 : index
    %c0_50 = arith.constant 0 : index
    %63 = vector.load %arg17[%c0_49, %c0_50] : memref<8x1xf32, #tpu.memory_space<vmem>>, vector<8x1xf32>
    tpu.vector_store %arg17[%c0_49, %c0_50], %62 {strides = array<i32>} : memref<8x1xf32, #tpu.memory_space<vmem>>, vector<8x1xf32>,
    return
  }
  func.func @transform_0(%arg0: i32) -> (i32, i32) {
    %c0_i32 = arith.constant 0 : i32
    %c0_i32_0 = arith.constant 0 : i32
    return %arg0, %c0_i32 : i32, i32
  }
  func.func @transform_1(%arg0: i32) -> (i32, i32) {
    %c0_i32 = arith.constant 0 : i32
    %c0_i32_0 = arith.constant 0 : i32
    %c0_i32_1 = arith.constant 0 : i32
    return %c0_i32, %c0_i32_0 : i32, i32
  }
  func.func @transform_2(%arg0: i32) -> (i32, i32) {
    %c0_i32 = arith.constant 0 : i32
    %c0_i32_0 = arith.constant 0 : i32
    %c0_i32_1 = arith.constant 0 : i32
    return %c0_i32, %c0_i32_0 : i32, i32
  }
  func.func @transform_3(%arg0: i32) -> (i32, i32) {
    %c0_i32 = arith.constant 0 : i32
    %c0_i32_0 = arith.constant 0 : i32
    %c0_i32_1 = arith.constant 0 : i32
    return %c0_i32, %c0_i32_0 : i32, i32
  }
  func.func @transform_4(%arg0: i32) -> (i32, i32) {
    %c0_i32 = arith.constant 0 : i32
    %c0_i32_0 = arith.constant 0 : i32
    %c0_i32_1 = arith.constant 0 : i32
    return %c0_i32, %c0_i32_0 : i32, i32
  }
  func.func @transform_5(%arg0: i32) -> (i32, i32) {
    %c0_i32 = arith.constant 0 : i32
    %c0_i32_0 = arith.constant 0 : i32
    %c0_i32_1 = arith.constant 0 : i32
    return %c0_i32, %c0_i32_0 : i32, i32
  }
  func.func @transform_6(%arg0: i32) -> (i32, i32) {
    %c0_i32 = arith.constant 0 : i32
    %c0_i32_0 = arith.constant 0 : i32
    %c0_i32_1 = arith.constant 0 : i32
    return %c0_i32, %c0_i32_0 : i32, i32
  }
  func.func @transform_7(%arg0: i32) -> (i32, i32) {
    %c0_i32 = arith.constant 0 : i32
    %c0_i32_0 = arith.constant 0 : i32
    %c0_i32_1 = arith.constant 0 : i32
    return %c0_i32, %c0_i32_0 : i32, i32
  }
  func.func @transform_8(%arg0: i32) -> (i32, i32) {
    %c0_i32 = arith.constant 0 : i32
    %c0_i32_0 = arith.constant 0 : i32
    %c0_i32_1 = arith.constant 0 : i32
    return %c0_i32, %c0_i32_0 : i32, i32
  }
  func.func @transform_9(%arg0: i32) -> (i32, i32) {
    %c0_i32 = arith.constant 0 : i32
    %c0_i32_0 = arith.constant 0 : i32
    %c0_i32_1 = arith.constant 0 : i32
    return %c0_i32, %c0_i32_0 : i32, i32
  }
  func.func @transform_10(%arg0: i32) -> (i32, i32) {
    %c0_i32 = arith.constant 0 : i32
    %c0_i32_0 = arith.constant 0 : i32
    %c0_i32_1 = arith.constant 0 : i32
    return %c0_i32, %c0_i32_0 : i32, i32
  }
  func.func @transform_11(%arg0: i32) -> (i32, i32) {
    %c0_i32 = arith.constant 0 : i32
    %c0_i32_0 = arith.constant 0 : i32
    %c0_i32_1 = arith.constant 0 : i32
    return %c0_i32, %c0_i32_0 : i32, i32
  }
  func.func @transform_12(%arg0: i32) -> (i32, i32) {
    %c0_i32 = arith.constant 0 : i32
    %c0_i32_0 = arith.constant 0 : i32
    %c0_i32_1 = arith.constant 0 : i32
    return %c0_i32, %c0_i32_0 : i32, i32
  }
  func.func @transform_13(%arg0: i32) -> (i32, i32) {
    %c0_i32 = arith.constant 0 : i32
    %c0_i32_0 = arith.constant 0 : i32
    %c0_i32_1 = arith.constant 0 : i32
    return %c0_i32, %c0_i32_0 : i32, i32
  }
  func.func @transform_14(%arg0: i32) -> (i32, i32) {
    %c0_i32 = arith.constant 0 : i32
    %c0_i32_0 = arith.constant 0 : i32
    %c0_i32_1 = arith.constant 0 : i32
    return %c0_i32, %c0_i32_0 : i32, i32
  }
  func.func @transform_15(%arg0: i32) -> (i32, i32) {
    %c0_i32 = arith.constant 0 : i32
    %c0_i32_0 = arith.constant 0 : i32
    %c0_i32_1 = arith.constant 0 : i32
    return %c0_i32, %c0_i32_0 : i32, i32
  }
  func.func @transform_16(%arg0: i32) -> (i32, i32) {
    %c0_i32 = arith.constant 0 : i32
    %c0_i32_0 = arith.constant 0 : i32
    return %arg0, %c0_i32 : i32, i32
  }
}

</mosaic_0001>

<bundles_post_ra>
// kernel: tpu_custom_call.1
= control target key start
LH: loop header
LB: loop body
LE: loop exit
PB: predicated region body
PF: predicated region fallthrough
CT: control target
= control target key end

     0   :  { %s2849_s0 = inlined_call_operand.hbm [shape: f32[16,24], index: 0, kind: input, shape index: {}]   ;;  %s2850_s1 = inlined_call_operand.hbm [shape: f32[24,32], index: 1, kind: input, shape index: {}]   ;;  %s2851_s2 = inlined_call_operand.vmem [shape: f32[32,32], index: 2, kind: input, shape index: {}]   ;;  %s2852_s3 = inlined_call_operand.hbm [shape: f32[32,128], index: 3, kind: input, shape index: {}]   ;;  %s2853_s4 = inlined_call_operand.vmem [shape: f32[128,256], index: 4, kind: input, shape index: {}]   ;;  %s2854_s5 = inlined_call_operand.hbm [shape: f32[24,128], index: 5, kind: input, shape index: {}]   ;;  %s2855_s6 = inlined_call_operand.vmem [shape: f32[128,4], index: 6, kind: input, shape index: {}]   ;;  %s2856_s7 = inlined_call_operand.hbm [shape: f32[4,128], index: 7, kind: input, shape index: {}]   ;;  %s2857_s8 = inlined_call_operand.vmem [shape: f32[128,32], index: 8, kind: input, shape index: {}]   ;;  %s2858_s9 = inlined_call_operand.vmem [shape: f32[32,32], index: 9, kind: input, shape index: {}]   ;;  %s2859_s10 = inlined_call_operand.vmem [shape: f32[32,1], index: 10, kind: input, shape index: {}]   ;;  %s2860_s11 = inlined_call_operand.vmem [shape: f32[2,32], index: 11, kind: input, shape index: {}]   ;;  %s2861_s12 = inlined_call_operand.vmem [shape: f32[2,32], index: 12, kind: input, shape index: {}]   ;;  %s2862_s13 = inlined_call_operand.vmem [shape: f32[1,128], index: 13, kind: input, shape index: {}]   ;;  %s2863_s14 = inlined_call_operand.vmem [shape: f32[1,256], index: 14, kind: input, shape index: {}]   ;;  %s2864_s15 = inlined_call_operand.<no memory space> [shape: f32[1,1], index: 15, kind: input, shape index: {}]   ;;  %s2865_s16 = inlined_call_operand.vmem [shape: f32[16,1], index: 16, kind: output, shape index: {}]  }
   0x1   :  { %2872 = sst [smem:[#allocation14_spill]] %s2849_s0  ;;  %v21_v0 = vstv %s2864_s15 }
   0x2   :  { %2873 = sst [smem:[#allocation15_spill]] %s2857_s8  ;;  %22 = vst [vmem:[#allocation2] sm:$0x1] %v21_v0 }
   0x3   :  { %2874 = sst [smem:[#allocation16_spill]] %s2858_s9 }
   0x4   :  { %2875 = sst [smem:[#allocation17_spill]] %s2859_s10 }
   0x5   :  { %2876 = sst [smem:[#allocation18_spill]] %s2862_s13 }
   0x6   :  { %2877 = sst [smem:[#allocation19_spill]] %s2863_s14 }
   0x7   :  { %2878 = sst [smem:[#allocation20_spill]] %s2865_s16 }
   0x8   :  { %23 = vsyncpa [#allocation4], 0 }
   0x9   :  { %25 = vsyncpa [#allocation4 + $0x1], 0 }
   0xa   :  { %26 = vsyncpa [#allocation6], 0 }
   0xb   :  { %27 = vsyncpa [#allocation9], 0  ;;  %s2293_s23 = smov 0   ;;  %s2295_s24 = smov 0  }
   0xc   :  { %s2297_s25 = smov 0   ;;  %s2299_s26 = smov 0  }
   0xd LB: > { %s2195_s15 = smov [#allocation5]   ;;  %s2314_s28 = sadd.s32 4294967295, %s2193_s26   ;;  %s2193_s26 = sphi %s2299_s26, %s2900_s26   ;;  %s2189_s25 = sphi %s2297_s25, %s2899_s25   ;;  %s2185_s24 = sphi %s2295_s24, %s2898_s24   ;;  %s2181_s23 = sphi %s2293_s23, %s2897_s23  }
   0xe   : > { %s417_s27 = sshll.u32 %s2195_s15, 4  ;;  %p1578_p0 = scmp.ge.s32.totalorder %s2193_s26, 1  ;;  %s2319_s27 = int_to_ptr.vmem [resolvable:$true] %s417_s27 }
   0xf   : > { %p2870_p1 = scmp.eq.s32.totalorder %s2314_s28, 0  ;;  %p405_p2 = scmp.lt.s32.totalorder %s2193_s26, 3 }
  0x10   : > { %s2196_s30 = smov [#allocation8]   ;;  %s2197_s18 = smov [#allocation7]  }
  0x11   : > { %p2321_p3 = pnand %p1578_p0, %p405_p2  ;;  %s449_s0 = sshll.u32 %s2196_s30, 4  ;;  %s2333_s0 = int_to_ptr.vmem [resolvable:$true] %s449_s0 }
  0x12   : > { %s433_s19 = sshll.u32 %s2197_s18, 4  ;;  %s2009_s22 = scalar_lea.hbm %s2850_s1, 384  ;;  %s2335_s19 = int_to_ptr.vmem [resolvable:$true] %s433_s19 }
  0x13   : > { %s2879_s29 = scalar_select %p2321_p3, 1, 0 }
  0x14   : > { %p1938_p4 = pneg %p2321_p3  ;;  %p2010_p6 = scmp.ne.s32.totalorder %s2850_s1, %s2009_s22 }
  0x15   : > { %p2016_p10 = scmp.lt.u32.totalorder %s2009_s22, %s2850_s1 }
  0x16   : > { %p2329_p5 = pnand %p1938_p4, %p2870_p1 }
  0x18   : > { %p2345_p7 = pneg %p2329_p5 }
  0x1a   : > { %p2012_p8 = pnand %p2345_p7, %p2010_p6 }
  0x1c   : > { %p2013_p9 = pneg %p2012_p8 }
  0x1e   : > { %p2018_p11 = pnand %p2016_p10, %p2013_p9 }
  0x20   : > { %2021 = shalt.err (!%p2018_p11)
}
  0x21   : > { %s2022_s16 = scalar_lea.vmem %s2319_s27, 384  ;;  %p2030_p2 = scmp.lt.s32.totalorder %s2319_s27, %s2319_s27 }
  0x22   : > { %p2023_p12 = scmp.ne.s32.totalorder %s2319_s27, %s2022_s16  ;;  %p2031_p4 = scmp.lt.s32.totalorder %s2022_s16, %s2022_s16 }
  0x24   : > { %p2025_p13 = pnand %p2023_p12, %p2345_p7  ;;  %p2032_p6 = por %p2031_p4, %p2030_p2 }
  0x26   : > { %p2026_p0 = pneg %p2025_p13 }
  0x28   : > { %p2033_p8 = pnand %p2032_p6, %p2026_p0 }
  0x2a   : > { %2036 = shalt.err (!%p2033_p8)
}
  0x2b   : > { %s2198_s20 = smov 128   ;;  %s2199_s10 = smov 8  }
  0x2c   : > { %1941 = dma.hbm_to_vmem [thread:$0]  (!%p2329_p5), %s2850_s1, 384, %s2319_s27, [#allocation6], %s2198_s20, %s2198_s20, %s2199_s10  }
  0x2d   : > { %s2037_s16 = scalar_lea.hbm %s2854_s5, 384 }
  0x2e   : > { %p2038_p9 = scmp.ne.s32.totalorder %s2854_s5, %s2037_s16  ;;  %p2044_p12 = scmp.lt.u32.totalorder %s2037_s16, %s2854_s5 }
  0x30   : > { %p2040_p10 = pnand %p2038_p9, %p2345_p7 }
  0x32   : > { %p2041_p11 = pneg %p2040_p10 }
  0x34   : > { %p2046_p13 = pnand %p2044_p12, %p2041_p11 }
  0x36   : > { %2049 = shalt.err (!%p2046_p13)
}
  0x37   : > { %s2050_s27 = scalar_lea.vmem %s2333_s0, 384  ;;  %p2058_p6 = scmp.lt.s32.totalorder %s2333_s0, %s2333_s0 }
  0x38   : > { %p2051_p0 = scmp.ne.s32.totalorder %s2333_s0, %s2050_s27  ;;  %p2059_p8 = scmp.lt.s32.totalorder %s2050_s27, %s2050_s27 }
  0x3a   : > { %p2053_p2 = pnand %p2051_p0, %p2345_p7  ;;  %p2060_p9 = por %p2059_p8, %p2058_p6 }
  0x3c   : > { %p2054_p4 = pneg %p2053_p2 }
  0x3e   : > { %p2061_p10 = pnand %p2060_p9, %p2054_p4 }
  0x40   : > { %2064 = shalt.err (!%p2061_p10)
}
  0x41   : > { %1947 = dma.hbm_to_vmem [thread:$0]  (!%p2329_p5), %s2854_s5, 384, %s2333_s0, [#allocation9], %s2198_s20, %s2198_s20, %s2199_s10  }
  0x42   : > { %s2065_s21 = scalar_lea.hbm %s2852_s3, 512 }
  0x43   : > { %p2066_p11 = scmp.ne.s32.totalorder %s2852_s3, %s2065_s21  ;;  %p2072_p0 = scmp.lt.u32.totalorder %s2065_s21, %s2852_s3 }
  0x45   : > { %p2068_p12 = pnand %p2066_p11, %p2345_p7 }
  0x47   : > { %p2069_p13 = pneg %p2068_p12 }
  0x49   : > { %p2074_p2 = pnand %p2072_p0, %p2069_p13 }
  0x4b   : > { %2077 = shalt.err (!%p2074_p2)
}
  0x4c   : > { %s2078_s0 = scalar_lea.vmem %s2335_s19, 512  ;;  %p2086_p9 = scmp.lt.s32.totalorder %s2335_s19, %s2335_s19 }
  0x4d   : > { %p2079_p4 = scmp.ne.s32.totalorder %s2335_s19, %s2078_s0  ;;  %p2087_p10 = scmp.lt.s32.totalorder %s2078_s0, %s2078_s0 }
  0x4f   : > { %p2081_p6 = pnand %p2079_p4, %p2345_p7  ;;  %p2088_p11 = por %p2087_p10, %p2086_p9 }
  0x51   : > { %p2082_p8 = pneg %p2081_p6 }
  0x53   : > { %p2089_p12 = pnand %p2088_p11, %p2082_p8 }
  0x55   : > { %2092 = shalt.err (!%p2089_p12)
}
  0x56   : > { %1944 = dma.hbm_to_vmem [thread:$0]  (!%p2329_p5), %s2852_s3, 512, %s2335_s19, [#allocation6], %s2198_s20, %s2198_s20, %s2199_s10  }
  0x57   : > { %s2200_s9 = smov [#allocation10]   ;;  %s2093_s22 = scalar_lea.hbm %s2856_s7, 64 }
  0x58   : > { %s466_s13 = sshll.u32 %s2200_s9, 4  ;;  %p2094_p13 = scmp.ne.s32.totalorder %s2856_s7, %s2093_s22  ;;  %s467_s13 = int_to_ptr.vmem [resolvable:$true] %s466_s13 }
  0x59   : > { %p2100_p4 = scmp.lt.u32.totalorder %s2093_s22, %s2856_s7 }
  0x5a   : > { %p2096_p0 = pnand %p2094_p13, %p2345_p7 }
  0x5c   : > { %p2097_p2 = pneg %p2096_p0 }
  0x5e   : > { %p2102_p6 = pnand %p2100_p4, %p2097_p2 }
  0x60   : > { %2105 = shalt.err (!%p2102_p6)
}
  0x61   : > { %s2106_s19 = scalar_lea.vmem %s467_s13, 64  ;;  %p2114_p11 = scmp.lt.s32.totalorder %s467_s13, %s467_s13 }
  0x62   : > { %p2107_p8 = scmp.ne.s32.totalorder %s467_s13, %s2106_s19  ;;  %p2115_p12 = scmp.lt.s32.totalorder %s2106_s19, %s2106_s19 }
  0x64   : > { %p2109_p9 = pnand %p2107_p8, %p2345_p7  ;;  %p2116_p1 = por %p2115_p12, %p2114_p11 }
  0x66   : > { %p2110_p10 = pneg %p2109_p9 }
  0x68   : > { %p2117_p3 = pnand %p2116_p1, %p2110_p10 }
  0x6a   : > { %2120 = shalt.err (!%p2117_p3)
}
  0x6b   : > { %1950 = dma.hbm_to_vmem [thread:$0]  (!%p2329_p5), %s2856_s7, 64, %s467_s13, [#allocation9]  }
  0x6c   : > { %s2440_s30 = sadd.s32 1, %s2193_s26   ;;  %s40_s17 = sadd.s32 1, %s2189_s25 }
  0x6d   : > { %s37_s27 = ssub.s32 %s2193_s26, %s2440_s30  ;;  %p47_p1 = scmp.ne.s32.totalorder %s2189_s25, %s2185_s24 }
  0x6e   : > { %p38_p3 = scmp.eq.s32.totalorder %s37_s27, 0  ;;  %p48_p7 = scmp.eq.s32.totalorder %s2193_s26, 0 }
  0x6f   : > { %p53_p13 = scmp.ne.s32.totalorder %s2185_s24, %s2181_s23  ;;  %p1959_p0 = scmp.lt.s32.totalorder %s2193_s26, 2 }
  0x70   : > { %s2452_s8 = scalar_select %p38_p3, %s2189_s25, %s40_s17  }
  0x71   : > { %p49_p2 = por %p48_p7, %p47_p1  ;;  %p2882_p4 = scmp.eq.s32.totalorder %s2314_s28, 0 }
  0x72   : > { %s501_s14 = sand.u32 1, %s2189_s25   ;;  %s1585_s13 = sshll.u32 %s2193_s26, 7 }
  0x73   : > { %p2456_p6 = por %p2882_p4, %p53_p13  ;;  %s1584_s21 = sshll.u32 %s501_s14, 3 }
  0x74   : > { %s2884_s18 = sld [smem:[#allocation14_spill]]  ;;  %s505_s23 = scalar_lea.vmem [#allocation3], %s1584_s21 }
  0x75   : > { %s512_s0 = sshll.u32 %s505_s23, 4  ;;  %p2467_p5 = pnand %p1959_p0, %p49_p2  ;;  %s2471_s0 = int_to_ptr.vmem [resolvable:$true] %s512_s0 }
  0x76   : > { %s502_s26 = scalar_lea.sflag [#allocation4], %s501_s14 }
  0x77   : > { %p2123_p9 = pneg %p2467_p5 }
  0x7a   : > { %s2465_s16 = scalar_lea.hbm %s2884_s18, %s1585_s13  ;;  %s2126_s27 = scalar_lea.hbm %s2884_s18, 256 }
  0x7b   : > { %s2121_s20 = scalar_lea.hbm %s2465_s16, 128  ;;  %p2127_p12 = scmp.lt.u32.totalorder %s2465_s16, %s2884_s18 }
  0x7c   : > { %p2122_p8 = scmp.ne.s32.totalorder %s2465_s16, %s2121_s20  ;;  %p2128_p1 = scmp.lt.u32.totalorder %s2126_s27, %s2121_s20 }
  0x7d   : > { %p2130_p7 = scmp.lt.u32.totalorder %s2121_s20, %s2465_s16 }
  0x7e   : > { %p2124_p10 = pnand %p2123_p9, %p2122_p8  ;;  %p2129_p3 = por %p2128_p1, %p2127_p12 }
  0x80   : > { %p2125_p11 = pneg %p2124_p10  ;;  %p2131_p13 = por %p2130_p7, %p2129_p3 }
  0x82   : > { %p2132_p0 = pnand %p2131_p13, %p2125_p11 }
  0x84   : > { %2135 = shalt.err (!%p2132_p0)
}
  0x85   : > { %s2136_s14 = scalar_lea.vmem %s2471_s0, 128  ;;  %s2201_s22 = smov [#allocation3]  }
  0x86   : > { %p2137_p2 = scmp.ne.s32.totalorder %s2471_s0, %s2136_s14  ;;  %s2141_s15 = sshll.u32 %s2201_s22, 4  ;;  %s2142_s15 = int_to_ptr.vmem [resolvable:$false] %s2141_s15 }
  0x87   : > { %s2143_s23 = scalar_lea.vmem %s2142_s15, 256  ;;  %p2144_p10 = scmp.lt.s32.totalorder %s2471_s0, %s2142_s15 }
  0x88   : > { %p2139_p4 = pnand %p2137_p2, %p2123_p9  ;;  %p2145_p12 = scmp.lt.s32.totalorder %s2143_s23, %s2136_s14 }
  0x8a   : > { %p2140_p8 = pneg %p2139_p4  ;;  %p2146_p1 = por %p2145_p12, %p2144_p10 }
  0x8c   : > { %p2147_p3 = pnand %p2146_p1, %p2140_p8 }
  0x8e   : > { %2150 = shalt.err (!%p2147_p3)
}
  0x8f   : > { %1954 = dma.hbm_to_vmem [thread:$0]  (!%p2467_p5), %s2465_s16, 128, %s2471_s0, %s502_s26  }
  0x90   : > { %p2886_p11 = scmp.ne.s32.totalorder %s2879_s29, 0 }
  0x91   : > { %s523_s20 = sand.u32 (!%p2886_p11), 1, %s2185_s24  }
  0x92   : > { %521 = sbr.rel (%p2886_p11) target bundleno = 2418 (0x972), region = 84  ;;  %s1587_s10 = sshll.u32 (!%p2886_p11), %s523_s20, 3 }
  0x93   : > { %s524_s17 = scalar_lea.sflag (!%p2886_p11), [#allocation4], %s523_s20  ;;  %s527_s27 = scalar_lea.vmem (!%p2886_p11), [#allocation3], %s1587_s10 }
  0x99   : > { %2168 = dma.done.wait (%p2456_p6), %s524_s17, 128  }
  0x9a   : > { %2170 = vsyncadd (%p2456_p6), %s524_s17, 4294967168  ;;  %p2887_p9 = scmp.eq.s32.totalorder %s2314_s28, 0 }
  0x9c   : > { %2172 = dma.done.wait (%p2887_p9), [#allocation6], 896   ;;  %p2888_p7 = pmov %p2887_p9 }
  0x9e   : > { %2174 = vsyncadd (%p2888_p7), [#allocation6], 4294966400  ;;  %p2889_p5 = pmov %p2888_p7 }
  0xa0   : > { %2176 = dma.done.wait (%p2889_p5), [#allocation9], 448   ;;  %p2890_p13 = pmov %p2889_p5 }
  0xa1   : > { %v2202_v1 = vmov 0.0|0.0   ;;  %vm2203_vm0 = vmmov 0   ;;  %v2204_v2 = vmov 0.0   ;;  %v596_v3 = vld [vmem:[#allocation5] sm:$0xff]  ;;  %v597_v4 = vld [vmem:[#allocation5 + $0x8] sm:$0xff]  ;;  %v680_v7 = vld [vmem:[%s2851_s2 + $0x8] sm:$0xff] }
  0xa2   : > { %2178 = vsyncadd (%p2890_p13), [#allocation9], 4294966848  ;;  %1810 = vmatprep.subr.bf16.mxu0 %v2202_v1  ;;  %1679 = vmatprep.mubr.msk.f32.mxu0 %vm2203_vm0, %v2204_v2  ;;  %v1811_v5 = vpack.c.bf16 %v597_v4, %v596_v3  ;;  %v679_v6 = vld [vmem:[%s2851_s2] sm:$0xff]  ;;  %vm604_vm1 = vcmask 195584   ;;  %v681_v11 = vld [vmem:[%s2851_s2 + $0x10] sm:$0xff]  ;;  %vm688_vm2 = vcmask 261120  }
  0xa3   : > { %1813 = vmatprep.subr.bf16.mxu1 %v2202_v1  ;;  %1690 = vmatprep.mubr.msk.f32.mxu1 %vm2203_vm0, %v2204_v2  ;;  %v1814_v8 = vpack.c.bf16 %v680_v7, %v679_v6  ;;  %v598_v9 = vld [vmem:[#allocation5 + $0x10] sm:$0xff]  ;;  %v682_v12 = vld [vmem:[%s2851_s2 + $0x18] sm:$0xff]  ;;  %v762_v14 = vld [vmem:[#allocation7] sm:$0xff]  ;;  %s2891_s15 = sld [smem:[#allocation18_spill]]  ;;  %s2892_s9 = sld [smem:[#allocation19_spill]]  ;;  %vm1122_vm3 = vcmask 31744  }
  0xa4   : > { %1812 = vmatpush3.bf16.msra.mxu0 %v1811_v5  ;;  %v2526_v10 = vld [vmem:[%s527_s27] sm:$0xff]  ;;  %v1817_v13 = vpack.c.bf16 %v682_v12, %v681_v11  ;;  %v763_v15 = vld [vmem:[#allocation7 + $0x8] sm:$0xff]  ;;  %v1593_v17 = vld [vmem:[%s2860_s11] ss:$0 sm:$0xff]  ;;  %vm1138_vm4 = vcmask 1043456   ;;  %s2893_s19 = sld [smem:[#allocation15_spill]] }
  0xa5   : > { %1677 = vmatprep.subr.mxu0 %v2204_v2  ;;  %1815 = vmatpush3.bf16.msra.mxu1 %v1814_v8  ;;  %v1820_v16 = vpack.c.bf16 %v763_v15, %v762_v14  ;;  %v764_v22 = vld [vmem:[#allocation7 + $0x10] sm:$0xff]  ;;  %v765_v23 = vld [vmem:[#allocation7 + $0x18] sm:$0xff]  ;;  %v849_v29 = vld [vmem:[%s2853_s4 + $0x10] sm:$0xff]  ;;  %s2894_s21 = sld [smem:[#allocation16_spill]]  ;;  %s2895_s16 = sld [smem:[#allocation17_spill]]  ;;  %vm1472_vm5 = vcmask 7168  }
  0xa6   : > { %1816 = vmatprep.subr.bf16.mxu1 %v2202_v1  ;;  %v1823_v24 = vpack.c.bf16 %v765_v23, %v764_v22  ;;  %v848_v25 = vld [vmem:[%s2853_s4 + $0x8] sm:$0xff]  ;;  %v850_v26 = vld [vmem:[%s2853_s4 + $0x18] sm:$0xff]  ;;  %v847_v27 = vld [vmem:[%s2853_s4] sm:$0xff]  ;;  %p591_p6 = scmp.lt.s32.totalorder %s2314_s28, 1  ;;  %s2896_s29 = sld [smem:[#allocation20_spill]] }
  0xa7   : > { %v1825_v28 = vpack.c.bf16 %v850_v26, %v848_v25  ;;  %v852_v30 = vld [vmem:[%s2853_s4 + $0x28] sm:$0xff]  ;;  %v854_v31 = vld [vmem:[%s2853_s4 + $0x38] sm:$0xff]  ;;  %v1827_v32 = vpack.c.bf16 %v849_v29, %v847_v27  ;;  %v851_v34 = vld [vmem:[%s2853_s4 + $0x20] sm:$0xff] }
  0xa8   : > { %1678 = vmatpush3.msra.mxu0 %v598_v9  ;;  %v1829_v33 = vpack.c.bf16 %v854_v31, %v852_v30  ;;  %v853_v35 = vld [vmem:[%s2853_s4 + $0x30] sm:$0xff]  ;;  %v856_v36 = vld [vmem:[%s2853_s4 + $0x48] sm:$0xff]  ;;  %v858_v37 = vld [vmem:[%s2853_s4 + $0x58] sm:$0xff]  ;;  %s2902_s28 = smov (!%p591_p6, %s2314_s28), 1 }
  0xa9   : > { %1680 = vmatmul.mubr.msk.f32.vlgmr.msra.gmra.mrb[0].mxu0 %vm604_vm1, %v2526_v10  ;;  %1819 = vmatprep.subr.bf16.mxu0 %v2202_v1  ;;  %v1831_v38 = vpack.c.bf16 %v853_v35, %v851_v34  ;;  %v1833_v39 = vpack.c.bf16 %v858_v37, %v856_v36  ;;  %v855_v40 = vld [vmem:[%s2853_s4 + $0x40] sm:$0xff]  ;;  %v857_v41 = vld [vmem:[%s2853_s4 + $0x50] sm:$0xff]  ;;  %v860_v42 = vld [vmem:[%s2853_s4 + $0x68] sm:$0xff]  ;;  %s1592_s10 = sshll.u32 %s2902_s28, 3 }
  0xaa   : > { %1701 = vmatprep.mubr.msk.f32.mxu0 %vm2203_vm0, %v2204_v2  ;;  %1818 = vmatpush3.bf16.msra.mxu1 %v1817_v13  ;;  %v862_v43 = vld [vmem:[%s2853_s4 + $0x78] sm:$0xff]  ;;  %v1835_v44 = vpack.c.bf16 %v857_v41, %v855_v40  ;;  %v859_v46 = vld [vmem:[%s2853_s4 + $0x60] sm:$0xff]  ;;  %v861_v47 = vld [vmem:[%s2853_s4 + $0x70] sm:$0xff] }
  0xab   : > { %1821 = vmatpush3.bf16.msra.mxu0 %v1820_v16  ;;  %1826 = vmatprep.subr.bf16.mxu1 %v1825_v28  ;;  %v1837_v45 = vpack.c.bf16 %v862_v43, %v860_v42  ;;  %v864_v48 = vld [vmem:[%s2853_s4 + $0x88] sm:$0xff]  ;;  %v866_v49 = vld [vmem:[%s2853_s4 + $0x98] sm:$0xff]  ;;  %v1839_v50 = vpack.c.bf16 %v861_v47, %v859_v46  ;;  %v863_v52 = vld [vmem:[%s2853_s4 + $0x80] sm:$0xff] }
  0xac   : > { %1822 = vmatprep.subr.bf16.mxu0 %v2202_v1  ;;  %v1841_v51 = vpack.c.bf16 %v866_v49, %v864_v48  ;;  %v865_v53 = vld [vmem:[%s2853_s4 + $0x90] sm:$0xff]  ;;  %v868_v54 = vld [vmem:[%s2853_s4 + $0xa8] sm:$0xff]  ;;  %v870_v55 = vld [vmem:[%s2853_s4 + $0xb8] sm:$0xff] }
  0xad   : > { %v1843_v56 = vpack.c.bf16 %v865_v53, %v863_v52  ;;  %v1845_v57 = vpack.c.bf16 %v870_v55, %v868_v54  ;;  %v867_v58 = vld [vmem:[%s2853_s4 + $0xa0] sm:$0xff]  ;;  %v869_v59 = vld [vmem:[%s2853_s4 + $0xb0] sm:$0xff]  ;;  %v872_v60 = vld [vmem:[%s2853_s4 + $0xc8] sm:$0xff] }
  0xae   : > { %v874_v61 = vld [vmem:[%s2853_s4 + $0xd8] sm:$0xff]  ;;  %v1847_v62 = vpack.c.bf16 %v869_v59, %v867_v58  ;;  %v871_v0 = vld [vmem:[%s2853_s4 + $0xc0] sm:$0xff]  ;;  %v873_v3 = vld [vmem:[%s2853_s4 + $0xd0] sm:$0xff] }
  0xaf   : > { %1824 = vmatpush3.bf16.msra.mxu0 %v1823_v24  ;;  %v1849_v63 = vpack.c.bf16 %v874_v61, %v872_v60  ;;  %v1851_v4 = vpack.c.bf16 %v873_v3, %v871_v0  ;;  %v1595_v5 = vld [vmem:[%s2861_s12] ss:$0 sm:$0xff]  ;;  %v876_v9 = vld [vmem:[%s2853_s4 + $0xe8] sm:$0xff]  ;;  %v878_v11 = vld [vmem:[%s2853_s4 + $0xf8] sm:$0xff] }
  0xb0   : > { %1857 = vmatprep.subr.bf16.mxu0 %v2202_v1  ;;  %v962_v12 = vld [vmem:[#allocation8] sm:$0xff]  ;;  %v1853_v13 = vpack.c.bf16 %v878_v11, %v876_v9  ;;  %v963_v14 = vld [vmem:[#allocation8 + $0x8] sm:$0xff]  ;;  %v875_v15 = vld [vmem:[%s2853_s4 + $0xe0] sm:$0xff] }
  0xb1   : > { %v877_v16 = vld [vmem:[%s2853_s4 + $0xf0] sm:$0xff]  ;;  %v1039_v24 = vld [vmem:[%s2855_s6 + $0x18] sm:$0xff]  ;;  %v1040_v26 = vld [vmem:[%s2855_s6 + $0x20] sm:$0xff] }
  0xb2   : > { %v1038_v22 = vld [vmem:[%s2855_s6 + $0x10] sm:$0xff]  ;;  %v1041_v27 = vld [vmem:[%s2855_s6 + $0x28] sm:$0xff]  ;;  %v1043_v29 = vld [vmem:[%s2855_s6 + $0x38] sm:$0xff] }
  0xb3   : > { %v1864_v25 = vpack.c.bf16 %v1039_v24, %v1038_v22  ;;  %v1867_v28 = vpack.c.bf16 %v1041_v27, %v1040_v26  ;;  %v1044_v31 = vld [vmem:[%s2855_s6 + $0x40] sm:$0xff]  ;;  %v1046_v34 = vld [vmem:[%s2855_s6 + $0x50] sm:$0xff]  ;;  %v1047_v35 = vld [vmem:[%s2855_s6 + $0x58] sm:$0xff] }
  0xb4   : > { %v1876_v36 = vpack.c.bf16 %v1047_v35, %v1046_v34  ;;  %v1048_v37 = vld [vmem:[%s2855_s6 + $0x60] sm:$0xff]  ;;  %v1051_v46 = vld [vmem:[%s2855_s6 + $0x78] sm:$0xff]  ;;  %v1223_v22 = vld [vmem:[%s2893_s19 + $0x50] sm:$0xff] }
  0xb5   : > { %v1597_v40 = vld [vmem:[%s2891_s15] ss:$0 sm:$0xff]  ;;  %v1216_v11 = vld [vmem:[%s2893_s19 + $0x18] sm:$0xff]  ;;  %v1226_v26 = vld [vmem:[%s2893_s19 + $0x68] sm:$0xff] }
  0xb6   : > { %v2723_v53 = vld [vmem:[%s2892_s9] sm:$0x3]  ;;  %v1306_v34 = vld [vmem:[%s2894_s21 + $0x8] sm:$0xff]  ;;  %s594_s9 = scalar_lea.vmem %s2896_s29, %s1592_s10 }
 0x17c   : > { %v674_v18 = vpop.f32.mrb[0].mxu0 }
 0x17d   : > { %v675_v19 = vadd.f32 %v1593_v17, %v674_v18  ;;  %v1681_v20 = vpop.f32.mrb[1].mxu0  ;;  %v1858_v17 = vpack.c.bf16 %v963_v14, %v962_v12  ;;  %v1855_v18 = vpack.c.bf16 %v877_v16, %v875_v15  ;;  %v1218_v14 = vld [vmem:[%s2893_s19 + $0x28] sm:$0xff]  ;;  %v1219_v16 = vld [vmem:[%s2893_s19 + $0x30] sm:$0xff] }
 0x17e   : > { %v1036_v20 = vld [vmem:[%s2855_s6] sm:$0xff] }
 0x17f   : > { %v678_v21 = vmax.f32 %v675_v19, 0.0  ;;  %v964_v19 = vld [vmem:[#allocation8 + $0x10] sm:$0xff] }
 0x181   : > { %1691 = vmatmul.mubr.msk.f32.vlgmr.msra.gmra.mrb[0].mxu1 %vm688_vm2, %v678_v21  ;;  %v1037_v21 = vld [vmem:[%s2855_s6 + $0x8] sm:$0xff] }
 0x182   : > { %955 = vmatprep.mubr.f32.mxu1 %v2204_v2  ;;  %1828 = vmatpush1.bf16.msra.mxu1 %v1827_v32  ;;  %v1861_v23 = vpack.c.bf16 %v1037_v21, %v1036_v20  ;;  %v1045_v32 = vld [vmem:[%s2855_s6 + $0x48] sm:$0xff] }
 0x183   : > { %1830 = vmatprep.subr.bf16.mxu1 %v1829_v33  ;;  %v1873_v33 = vpack.c.bf16 %v1045_v32, %v1044_v31  ;;  %v1222_v20 = vld [vmem:[%s2893_s19 + $0x48] sm:$0xff]  ;;  %v1228_v31 = vld [vmem:[%s2893_s19 + $0x78] sm:$0xff] }
 0x186   : > { %1832 = vmatpush1.bf16.msra.mxu1 %v1831_v38  ;;  %v1049_v38 = vld [vmem:[%s2855_s6 + $0x68] sm:$0xff] }
 0x187   : > { %1834 = vmatprep.subr.bf16.mxu1 %v1833_v39  ;;  %v1879_v39 = vpack.c.bf16 %v1049_v38, %v1048_v37 }
 0x18a   : > { %1836 = vmatpush1.bf16.msra.mxu1 %v1835_v44 }
 0x18b   : > { %1838 = vmatprep.subr.bf16.mxu1 %v1837_v45  ;;  %v1050_v45 = vld [vmem:[%s2855_s6 + $0x70] sm:$0xff] }
 0x18c   : > { %v1882_v47 = vpack.c.bf16 %v1051_v46, %v1050_v45  ;;  %v1602_v45 = vld [vmem:[%s2860_s11 + $0x1] ss:$0 sm:$0xff] }
 0x18d   : > { %v1388_v46 = vld [vmem:[%s2895_s16] sm:$0xff] }
 0x18e   : > { %1840 = vmatpush1.bf16.msra.mxu1 %v1839_v50  ;;  %v881_v50 = vlaneseq }
 0x18f   : > { %1842 = vmatprep.subr.bf16.mxu1 %v1841_v51 }
 0x190   : > { %v2717_v51 = vshrl.u32 %v881_v50, 7 }
 0x192   : > { %1844 = vmatpush1.bf16.msra.mxu1 %v1843_v56  ;;  %v883_v52 = vsub.s32 0, %v2717_v51 }
 0x193   : > { %1846 = vmatprep.subr.bf16.mxu1 %v1845_v57 }
 0x194   : > { %v884_v54 = vrot.slane %v2723_v53, %v883_v52 }
 0x196   : > { %1848 = vmatpush1.bf16.msra.mxu1 %v1847_v62 }
 0x197   : > { %1850 = vmatprep.subr.bf16.mxu1 %v1849_v63 }
 0x19a   : > { %1852 = vmatpush1.bf16.msra.mxu1 %v1851_v4 }
 0x19b   : > { %1854 = vmatprep.subr.bf16.mxu1 %v1853_v13  ;;  %v1217_v13 = vld [vmem:[%s2893_s19 + $0x20] sm:$0xff] }
 0x19c   : > { %v1891_v15 = vpack.c.bf16 %v1218_v14, %v1217_v13 }
 0x19e   : > { %1856 = vmatpush1.bf16.msra.mxu1 %v1855_v18 }
 0x19f   : > { %1884 = vmatprep.subr.bf16.mxu1 %v2202_v1 }
 0x254   : > { %v758_v6 = vpop.f32.mrb[0].mxu1 }
 0x255   : > { %v759_v7 = vadd.f32 %v1595_v5, %v758_v6  ;;  %v1692_v8 = vpop.f32.mrb[1].mxu1  ;;  %v1134_v5 = vld [vmem:[#allocation10] sm:$0xf] }
 0x256   : > { %v1213_v6 = vld [vmem:[%s2893_s19] sm:$0xff]  ;;  %v1215_v8 = vld [vmem:[%s2893_s19 + $0x10] sm:$0xff] }
 0x257   : > { %1702 = vmatmul.mubr.msk.f32.vlgmr.msra.gmra.mrb[2].mxu0 %vm688_vm2, %v759_v7  ;;  %v1214_v7 = vld [vmem:[%s2893_s19 + $0x8] sm:$0xff]  ;;  %v1888_v12 = vpack.c.bf16 %v1216_v11, %v1215_v8 }
 0x258   : > { %1710 = vmatprep.mubr.msk.f32.mxu0 %vm2203_vm0, %v2204_v2  ;;  %1859 = vmatpush3.bf16.msra.mxu0 %v1858_v17  ;;  %v1885_v9 = vpack.c.bf16 %v1214_v7, %v1213_v6  ;;  %v1220_v17 = vld [vmem:[%s2893_s19 + $0x38] sm:$0xff] }
 0x259   : > { %1708 = vmatprep.subr.mxu0 %v2204_v2  ;;  %v1894_v18 = vpack.c.bf16 %v1220_v17, %v1219_v16 }
 0x25c   : > { %1709 = vmatpush3.msra.mxu0 %v964_v19  ;;  %v1221_v19 = vld [vmem:[%s2893_s19 + $0x40] sm:$0xff] }
 0x25d   : > { %1711 = vmatmul.mubr.msk.f32.vlgmr.msra.gmra.mrb[4].mxu0 %vm604_vm1, %v2526_v10  ;;  %1860 = vmatprep.subr.bf16.mxu0 %v2202_v1  ;;  %v1042_v10 = vld [vmem:[%s2855_s6 + $0x30] sm:$0xff]  ;;  %v1897_v21 = vpack.c.bf16 %v1222_v20, %v1221_v19 }
 0x25e   : > { %1862 = vmatpush3.bf16.msra.mxu0 %v1861_v23  ;;  %1745 = vmatprep.mubr.msk.f32.mxu0 %vm2203_vm0, %v2204_v2  ;;  %v1870_v30 = vpack.c.bf16 %v1043_v29, %v1042_v10  ;;  %v1224_v23 = vld [vmem:[%s2893_s19 + $0x58] sm:$0xff] }
 0x25f   : > { %1863 = vmatprep.subr.bf16.mxu0 %v2202_v1  ;;  %v1900_v24 = vpack.c.bf16 %v1224_v23, %v1223_v22 }
 0x262   : > { %1865 = vmatpush3.bf16.msra.mxu0 %v1864_v25  ;;  %v1225_v25 = vld [vmem:[%s2893_s19 + $0x60] sm:$0xff] }
 0x263   : > { %1866 = vmatprep.subr.bf16.mxu0 %v2202_v1  ;;  %v1903_v27 = vpack.c.bf16 %v1226_v26, %v1225_v25 }
 0x266   : > { %1868 = vmatpush3.bf16.msra.mxu0 %v1867_v28 }
 0x267   : > { %1869 = vmatprep.subr.bf16.mxu0 %v2202_v1 }
 0x26a   : > { %1871 = vmatpush3.bf16.msra.mxu0 %v1870_v30  ;;  %v1227_v30 = vld [vmem:[%s2893_s19 + $0x70] sm:$0xff] }
 0x26b   : > { %1872 = vmatprep.subr.bf16.mxu0 %v2202_v1  ;;  %v1906_v32 = vpack.c.bf16 %v1228_v31, %v1227_v30 }
 0x26e   : > { %1874 = vmatpush3.bf16.msra.mxu0 %v1873_v33  ;;  %v1305_v33 = vld [vmem:[%s2894_s21] sm:$0xff] }
 0x26f   : > { %1875 = vmatprep.subr.bf16.mxu0 %v2202_v1  ;;  %v1909_v35 = vpack.c.bf16 %v1306_v34, %v1305_v33 }
 0x272   : > { %1877 = vmatpush3.bf16.msra.mxu0 %v1876_v36  ;;  %v887_v36 = vsub.s32 1, %v2717_v51 }
 0x273   : > { %1878 = vmatprep.subr.bf16.mxu0 %v2202_v1 }
 0x274   : > { %v888_v37 = vrot.slane %v2723_v53, %v887_v36  ;;  %v1390_v53 = vld [vmem:[%s2895_s16 + $0x10] sm:$0xff] }
 0x276   : > { %1880 = vmatpush3.bf16.msra.mxu0 %v1879_v39 }
 0x277   : > { %1881 = vmatprep.subr.bf16.mxu0 %v2202_v1 }
 0x27a   : > { %1883 = vmatpush3.bf16.msra.mxu0 %v1882_v47  ;;  %v1389_v47 = vld [vmem:[%s2895_s16 + $0x8] sm:$0xff] }
 0x27b   : > { %1748 = vmatprep.subr.mxu0 %v2204_v2  ;;  %v1915_v51 = vpack.c.bf16 %v1389_v47, %v1388_v46 }
 0x32a   : > { %v842_v41 = vpop.f32.mrb[2].mxu0 }
 0x32b   : > { %v843_v42 = vadd.f32 %v1597_v40, %v842_v41  ;;  %v1703_v43 = vpop.f32.mrb[3].mxu0 }
 0x32c   : > { %v1308_v43 = vld [vmem:[%s2894_s21 + $0x18] sm:$0xff] }
 0x32d   : > { %v846_v44 = vmax.f32 %v843_v42, 0.0  ;;  %v1307_v42 = vld [vmem:[%s2894_s21 + $0x10] sm:$0xff] }
 0x32f   : > { %956 = vmatmul.mubr.f32.vlgmr.msra.gmra.mrb[2].mxu1 %v846_v44  ;;  %v1912_v44 = vpack.c.bf16 %v1308_v43, %v1307_v42 }
 0x330   : > { %1785 = vmatprep.mubr.msk.f32.mxu1 %vm2203_vm0, %v2204_v2  ;;  %v1031_v48 = vpop.f32.mrb[4].mxu0  ;;  %1886 = vmatpush3.bf16.msra.mxu1 %v1885_v9 }
 0x331   : > { %v1712_v49 = vpop.f32.mrb[5].mxu0  ;;  %1887 = vmatprep.subr.bf16.mxu1 %v2202_v1 }
 0x334   : > { %1889 = vmatpush3.bf16.msra.mxu1 %v1888_v12 }
 0x335   : > { %1890 = vmatprep.subr.bf16.mxu1 %v2202_v1 }
 0x338   : > { %1892 = vmatpush3.bf16.msra.mxu1 %v1891_v15 }
 0x339   : > { %1893 = vmatprep.subr.bf16.mxu1 %v2202_v1 }
 0x33c   : > { %1895 = vmatpush3.bf16.msra.mxu1 %v1894_v18 }
 0x33d   : > { %1896 = vmatprep.subr.bf16.mxu1 %v2202_v1 }
 0x340   : > { %1898 = vmatpush3.bf16.msra.mxu1 %v1897_v21 }
 0x341   : > { %1899 = vmatprep.subr.bf16.mxu1 %v2202_v1 }
 0x344   : > { %1901 = vmatpush3.bf16.msra.mxu1 %v1900_v24 }
 0x345   : > { %1902 = vmatprep.subr.bf16.mxu1 %v2202_v1 }
 0x348   : > { %1904 = vmatpush3.bf16.msra.mxu1 %v1903_v27 }
 0x349   : > { %1905 = vmatprep.subr.bf16.mxu1 %v2202_v1 }
 0x34c   : > { %1907 = vmatpush3.bf16.msra.mxu1 %v1906_v32 }
 0x402   : > { %v957_v55 = vpop.f32.mrb[2].mxu1 }
 0x403   : > { %v958_v56 = vadd.f32 %v957_v55, %v884_v54  ;;  %v2726_v57 = vpop.f32.mrb[3].mxu1  ;;  %v1391_v54 = vld [vmem:[%s2895_s16 + $0x18] sm:$0xff] }
 0x404   : > { %v960_v38 = vadd.f32 %v2726_v57, %v888_v37  ;;  %v1918_v55 = vpack.c.bf16 %v1391_v54, %v1390_v53 }
 0x405   : > { %v1035_v58 = vmul.f32 %v1031_v48, %v958_v56  ;;  %v1603_v56 = vld [vmem:[%s2861_s12 + $0x1] ss:$0 sm:$0xff] }
 0x407   : > { %1746 = vmatmul.mubr.f32.vlgmr.msra.gmra.mrb[6].mxu0 %v1035_v58 }
 0x408   : > { %1750 = vmatprep.mubr.msk.f32.mxu0 %vm2203_vm0, %v2204_v2  ;;  %1749 = vmatpush3.msk.msra.mxu0 %vm1138_vm4, %v1134_v5 }
 0x409   : > { %1908 = vmatprep.subr.bf16.mxu0 %v2202_v1 }
 0x4da   : > { %v1118_v59 = vpop.f32.mrb[6].mxu0 }
 0x4db   : > { %v1747_v60 = vpop.f32.mrb[7].mxu0  ;;  %v1123_v61 = vsel %vm1122_vm3, %v1118_v59, -inf }
 0x4dc   : > { %1124 = vmax.xlane.f32.xlu0 %v1123_v61 }
 0x569   : > { %v1125_v62 = vpop.xlane.xlu0 %1124 }
 0x56a   : > { %v1126_v63 = vsub.f32 %v1118_v59, %v1125_v62 }
 0x56c   : > { %v1127_v0 = vmul.f32 1.442695, %v1126_v63 }
 0x56e   : > { %2005 = vpow2.f32 %v1127_v0 }
 0x578   : > { %v2006_v3 = vpop.eup %2005 }
 0x579   : > { %v1129_v4 = vsel %vm1122_vm3, %v2006_v3, 0.0 }
 0x57a   : > { %1130 = vadd.xlane.f32.xlu0 %v1129_v4 }
 0x607   : > { %v1131_v28 = vpop.xlane.xlu0 %1130 }
 0x608   : > { %2007 = vrcp.f32 %v1131_v28 }
 0x612   : > { %v2008_v10 = vpop.eup %2007 }
 0x613   : > { %v1133_v29 = vmul.f32 %v2008_v10, %v2006_v3 }
 0x615   : > { %1751 = vmatmul.mubr.msk.f32.vlgmr.msra.gmra.mrb[8].mxu0 %vm1122_vm3, %v1133_v29 }
 0x616   : > { %1796 = vmatprep.mubr.msk.f32.mxu0 %vm2203_vm0, %v2204_v2  ;;  %1910 = vmatpush3.bf16.msra.mxu0 %v1909_v35 }
 0x617   : > { %1911 = vmatprep.subr.bf16.mxu0 %v2202_v1 }
 0x61a   : > { %1913 = vmatpush3.bf16.msra.mxu0 %v1912_v44 }
 0x61b   : > { %1914 = vmatprep.subr.bf16.mxu0 %v2202_v1 }
 0x6e8   : > { %v1208_v39 = vpop.f32.mrb[8].mxu0 }
 0x6e9   : > { %v1212_v40 = vmul.f32 %v1208_v39, %v960_v38  ;;  %v1752_v41 = vpop.f32.mrb[9].mxu0 }
 0x6eb   : > { %1786 = vmatmul.mubr.f32.vlgmr.msra.gmra.mrb[4].mxu1 %v1212_v40 }
 0x7be   : > { %v1300_v48 = vpop.f32.mrb[4].mxu1 }
 0x7bf   : > { %v1301_v49 = vadd.f32 %v1602_v45, %v1300_v48  ;;  %v1787_v50 = vpop.f32.mrb[5].mxu1 }
 0x7c1   : > { %v1304_v52 = vmax.f32 %v1301_v49, 0.0 }
 0x7c3   : > { %1797 = vmatmul.mubr.msk.f32.vlgmr.msra.gmra.mrb[10].mxu0 %vm688_vm2, %v1304_v52 }
 0x7c4   : > { %1916 = vmatpush3.bf16.msra.mxu0 %v1915_v51  ;;  %1807 = vmatprep.mubr.msk.f32.mxu0 %vm2203_vm0, %v2204_v2 }
 0x7c5   : > { %1917 = vmatprep.subr.bf16.mxu0 %v2202_v1  ;;  %v1605_v1 = vld [vmem:[#allocation2] ss:$0 sm:$0xff] }
 0x7c8   : > { %1919 = vmatpush3.bf16.msra.mxu0 %v1918_v55 }
 0x896   : > { %v1383_v57 = vpop.f32.mrb[10].mxu0 }
 0x897   : > { %v1384_v58 = vadd.f32 %v1603_v56, %v1383_v57  ;;  %v1798_v59 = vpop.f32.mrb[11].mxu0 }
 0x899   : > { %v1387_v2 = vmax.f32 %v1384_v58, 0.0 }
 0x89b   : > { %1808 = vmatmul.mubr.msk.f32.vlgmr.msra.gmra.mrb[12].mxu0 %vm688_vm2, %v1387_v2 }
 0x96e   : > { %v1468_v60 = vpop.f32.mrb[12].mxu0 }
 0x96f   : > { %v1469_v61 = vadd.f32 %v1605_v1, %v1468_v60  ;;  %v1809_v62 = vpop.f32.mrb[13].mxu0 }
 0x971   : > { %1473 = vst.msk [vmem:[%s594_s9] sm:$0xff] %vm1472_vm5, %v1469_v61 }
 0x972 PF: > { %p30_p0 = scmp.ge.s32.totalorder %s2440_s30, 4   ;;  %s2897_s23 = smov %s2185_s24 }
 0x973   : > { %s2898_s24 = smov %s2189_s25  ;;  %s2899_s25 = smov %s2452_s8 }
 0x974   : > { %s2900_s26 = smov %s2440_s30  ;;  %32 = sbr.rel (!%p30_p0) target bundleno = 13 (0xd), region = 140 }
 0x97b   :  { %1493 = vsyncpa [#allocation4], 1 }
 0x97c   :  { %1495 = vsyncpa [#allocation4 + $0x1], 1 }
 0x97d   :  { %1496 = vsyncpa [#allocation6], 1 }
 0x97e   :  { %1497 = vsyncpa [#allocation9], 1 }

</bundles_post_ra>
